<compile_context>
chip_gen: v7x
topology: tpu7x:2x2x1
jax: 0.10.0
libtpu: 0.0.40
codegen_flags: <defaults>
</compile_context>

<pallas_src>
import functools

import jax
import jax.numpy as jnp
from jax.experimental import pallas as pl
from jax.experimental.pallas import tpu as pltpu


def _attention_head_kernel(z_ref, wqkv_ref, o_ref, *, scale):
    # z_ref:    (Bt*N, d_in)            -- streamed input slab (native dtype)
    # wqkv_ref: (d_in, 2*d_qp + d_vp)   -- pre-transposed, lane-padded Wq|Wk|Wv
    # o_ref:    (Bt, N, d_vp)
    bt, n, d_vp = o_ref.shape
    d_tot = wqkv_ref.shape[1]
    d_qp = (d_tot - d_vp) // 2
    in_dtype = z_ref.dtype

    # One fused projection matmul (single RHS load, LHS pushed once).
    qkv = jnp.dot(z_ref[...], wqkv_ref[...],
                  preferred_element_type=jnp.float32)        # (Bt*N, d_tot) f32

    # 128-aligned lane slices are free; fold 1/sqrt(d_q) into the f32 q (exact
    # even for bf16 weights), then drop back to the input dtype for the MXU.
    q = (qkv[:, :d_qp] * scale).astype(in_dtype).reshape(bt, n, d_qp)
    k = qkv[:, d_qp:2 * d_qp].astype(in_dtype).reshape(bt, n, d_qp)
    v = qkv[:, 2 * d_qp:].astype(in_dtype).reshape(bt, n, d_vp)

    # Scores: contract last dims directly (no in-kernel transpose), f32 acc.
    s = jnp.einsum("bnq,bmq->bnm", q, k,
                   preferred_element_type=jnp.float32)        # (Bt, N, N) f32

    # Numerically-stable softmax over keys; 1/sum is applied to the (N, d_vp)
    # output slab rather than the (N, N) probability matrix.
    m = jnp.max(s, axis=-1, keepdims=True)
    p = jnp.exp(s - m)
    denom = jnp.sum(p, axis=-1, keepdims=True)

    out = jnp.einsum("bnm,bmv->bnv", p.astype(in_dtype), v,
                     preferred_element_type=jnp.float32)      # (Bt, N, d_vp) f32

    # EUP approximate reciprocal + one Newton step -> ~exact 1/denom.
    r = pl.reciprocal(denom, approx=True)
    r = r * (2.0 - denom * r)
    o_ref[...] = (out * r).astype(o_ref.dtype)


def _round_up(x, m):
    return (x + m - 1) // m * m


def _vmem_capacity_bytes():
    try:
        return int(pltpu.get_tpu_info().vmem_capacity_bytes)
    except Exception:
        return 64 * 1024 * 1024  # conservative (v7x-sized) fallback


def _step_vmem_bytes(bt, N, d_in, d_tot, d_qp, d_vp, itemsize, out_itemsize):
    rows = bt * N
    # Double-buffered pipelined blocks (streamed z + out, invariant weights).
    blocks = 2 * (rows * d_in * itemsize
                  + bt * N * d_vp * out_itemsize
                  + d_in * d_tot * itemsize)
    # Live intermediates inside one step.
    inter = rows * d_tot * (4 + itemsize)          # f32 qkv + q/k/v casts
    inter += bt * N * N * (8 + itemsize)           # f32 s + f32 p + p cast
    inter += rows * d_vp * (4 + out_itemsize)      # f32 out + store cast
    return blocks + inter


def _pick_batch_tile(B, N, d_in, d_tot, d_qp, d_vp, itemsize, out_itemsize, budget):
    """Largest batch tile Bt that (a) divides B, (b) keeps the flattened row
    block sublane-legal, (c) fits the VMEM budget, and (d) leaves >= 2 grid
    steps when B >= 2 so both v7x TensorCores get work."""

    def legal(bt):
        return B % bt == 0 and ((bt * N) % 8 == 0 or bt == B)

    def fits(bt):
        return _step_vmem_bytes(bt, N, d_in, d_tot, d_qp, d_vp,
                                itemsize, out_itemsize) <= budget

    best = None
    for bt in range(1, max(1, B // 2) + 1):          # keep >= 2 parallel steps
        if legal(bt) and fits(bt):
            best = bt
    if best is None:                                  # fall back: smallest legal tile
        for bt in range(1, B + 1):
            if legal(bt) and fits(bt):
                best = bt
                break
    if best is None:
        # Nothing fits the budget (very large N): smallest legal tile anyway.
        # TODO(synk): flash/KV-tiled online-softmax path for this regime.
        best = next(bt for bt in range(1, B + 1) if legal(bt))
    return best


def attention_head(z, wq, wk, wv):
    """z: (B, N, d_in); wq, wk: (d_q, d_in); wv: (d_v, d_in). Returns (B, N, d_v)."""
    B, N, d_in = z.shape
    d_q = wq.shape[0]
    d_v = wv.shape[0]

    d_qp = _round_up(d_q, 128)
    d_vp = _round_up(d_v, 128)
    d_tot = 2 * d_qp + d_vp

    # Fused, pre-transposed, lane-padded QKV weight: [Wq^T | Wk^T | Wv^T].
    wqkv_t = jnp.zeros((d_in, d_tot), wq.dtype)
    wqkv_t = wqkv_t.at[:, :d_q].set(wq.T)
    wqkv_t = wqkv_t.at[:, d_qp:d_qp + d_q].set(wk.T)
    wqkv_t = wqkv_t.at[:, 2 * d_qp:2 * d_qp + d_v].set(wv.T)

    # Lane-dense 2-D input slab (contiguous reshape outside the kernel is free).
    z2d = z.reshape(B * N, d_in)

    vmem_cap = _vmem_capacity_bytes()
    budget = int(vmem_cap * 0.55)
    vmem_limit = int(vmem_cap * 0.75)

    Bt = _pick_batch_tile(B, N, d_in, d_tot, d_qp, d_vp,
                          z.dtype.itemsize, z.dtype.itemsize, budget)

    cost = pl.CostEstimate(
        flops=2 * B * N * d_in * d_tot + 2 * B * N * N * (d_qp + d_vp),
        transcendentals=B * N * N + B * N,
        bytes_accessed=(z2d.size * z2d.dtype.itemsize
                        + wqkv_t.size * wqkv_t.dtype.itemsize
                        + B * N * d_vp * z.dtype.itemsize),
    )

    kernel = functools.partial(_attention_head_kernel, scale=float(d_q) ** -0.5)

    out_padded = pl.pallas_call(
        kernel,
        out_shape=jax.ShapeDtypeStruct((B, N, d_vp), z.dtype),
        grid_spec=pltpu.PrefetchScalarGridSpec(
            num_scalar_prefetch=0,
            grid=(B // Bt,),
            in_specs=[
                pl.BlockSpec((Bt * N, d_in), lambda b: (b, 0)),
                pl.BlockSpec((d_in, d_tot), lambda b: (0, 0)),
            ],
            out_specs=pl.BlockSpec((Bt, N, d_vp), lambda b: (b, 0, 0)),
        ),
        compiler_params=pltpu.CompilerParams(
            dimension_semantics=("parallel",),
            vmem_limit_bytes=vmem_limit,
        ),
        cost_estimate=cost,
    )(z2d, wqkv_t)

    return out_padded[:, :, :d_v]


def attention_head_ref(z, wq, wk, wv):
    """Pure-JAX reference mirroring the PyTorch forward."""
    q = jnp.einsum("bnd,qd->bnq", z, wq)
    k = jnp.einsum("bnd,qd->bnq", z, wk)
    v = jnp.einsum("bnd,vd->bnv", z, wv)
    d_q = wq.shape[0]
    s = jnp.einsum("bnq,bmq->bnm", q, k) * (d_q ** -0.5)
    p = jax.nn.softmax(s, axis=-1)
    return jnp.einsum("bnm,bmv->bnv", p, v)


if __name__ == "__main__":
    # Small shapes consistent with the module's forward: z is (B, N, d_in).
    B, N = 2, 8
    input_dim, query_dim, encoding_dim = 32, 16, 32

    key = jax.random.PRNGKey(0)
    kz, kq, kk, kv = jax.random.split(key, 4)

    z = jax.random.normal(kz, (B, N, input_dim), dtype=jnp.float32)
    # Deterministic "normal_(mean=0, std=0.02)" init, nn.Linear weight layout (out, in).
    wq = 0.02 * jax.random.normal(kq, (query_dim, input_dim), dtype=jnp.float32)
    wk = 0.02 * jax.random.normal(kk, (query_dim, input_dim), dtype=jnp.float32)
    wv = 0.02 * jax.random.normal(kv, (encoding_dim, input_dim), dtype=jnp.float32)

    out = attention_head(z, wq, wk, wv)
    out = jax.block_until_ready(out)

    ref = attention_head_ref(z, wq, wk, wv)
    assert out.shape == (B, N, encoding_dim)
    # Newton-refined reciprocal restores near-exact softmax normalization.
    assert jnp.allclose(out, ref, atol=1e-4, rtol=1e-4), "mismatch vs reference"

    print("KERNEL_OK")
</pallas_src>

<mosaic_0001>
module attributes {stable_mosaic.version = 11 : i64} {
  func.func @_attention_head_kernel(%arg0: i32, %arg1: memref<8x32xf32, #tpu.memory_space<vmem>>, %arg2: memref<32x384xf32, #tpu.memory_space<vmem>>, %arg3: memref<1x8x128xf32, #tpu.memory_space<vmem>>) attributes {dimension_semantics = [#tpu.dimension_semantics<parallel>], iteration_bounds = array<i64: 2>, scalar_prefetch = 0 : i64, scratch_operands = 0 : i64, tpu.core_type = #tpu.core_type<tc>, window_params = [{transform_indices = @transform_0, window_bounds = array<i64: 8, 32>}, {pipeline_mode = #tpu.pipeline_mode<synchronous>, transform_indices = @transform_1, window_bounds = array<i64: 32, 384>}, {transform_indices = @transform_2, window_bounds = array<i64: 1, 8, 128>}]} {
    %c0 = arith.constant 0 : index
    %c0_0 = arith.constant 0 : index
    %0 = vector.load %arg1[%c0, %c0_0] : memref<8x32xf32, #tpu.memory_space<vmem>>, vector<8x32xf32>
    %c0_1 = arith.constant 0 : index
    %c0_2 = arith.constant 0 : index
    %1 = vector.load %arg2[%c0_1, %c0_2] : memref<32x384xf32, #tpu.memory_space<vmem>>, vector<32x384xf32>
    %cst = arith.constant dense<0.000000e+00> : vector<8x384xf32>
    %2 = tpu.matmul %0, %1, %cst {dimension_numbers = #tpu.dot_dimension_numbers<[1], [0], [0], [1], [0, 0, 1, 1], [], []>} : vector<8x32xf32>, vector<32x384xf32>, vector<8x384xf32> -> vector<8x384xf32>
    %3 = vector.extract_strided_slice %2 {offsets = [0, 0], sizes = [8, 128], strides = [1, 1]} : vector<8x384xf32> to vector<8x128xf32>
    %cst_3 = arith.constant 2.500000e-01 : f32
    %4 = vector.broadcast %cst_3 : f32 to vector<8x128xf32>
    %5 = arith.mulf %3, %4 : vector<8x128xf32>
    %6 = vector.shape_cast %5 : vector<8x128xf32> to vector<1x8x128xf32>
    %7 = vector.extract_strided_slice %2 {offsets = [0, 128], sizes = [8, 128], strides = [1, 1]} : vector<8x384xf32> to vector<8x128xf32>
    %8 = vector.shape_cast %7 : vector<8x128xf32> to vector<1x8x128xf32>
    %9 = vector.extract_strided_slice %2 {offsets = [0, 256], sizes = [8, 128], strides = [1, 1]} : vector<8x384xf32> to vector<8x128xf32>
    %10 = vector.shape_cast %9 : vector<8x128xf32> to vector<1x8x128xf32>
    "tpu.trace_start"() <{level = 10 : i32, message = "bnq,bmq->bnm"}> : () -> ()
    %cst_4 = arith.constant dense<0.000000e+00> : vector<1x8x8xf32>
    %11 = tpu.matmul %6, %8, %cst_4 {dimension_numbers = #tpu.dot_dimension_numbers<[2], [2], [1], [1], [0, 0, 0, 1, 1, 1], [0], [0]>} : vector<1x8x128xf32>, vector<1x8x128xf32>, vector<1x8x8xf32> -> vector<1x8x8xf32>
    "tpu.trace_stop"() : () -> ()
    %cst_5 = arith.constant dense<0xFF800000> : vector<1x8xf32>
    %12 = vector.multi_reduction <maximumf>, %11, %cst_5 [2] : vector<1x8x8xf32> to vector<1x8xf32>
    %13 = vector.shape_cast %12 : vector<1x8xf32> to vector<1x8x1xf32>
    %14 = vector.broadcast %13 : vector<1x8x1xf32> to vector<1x8x8xf32>
    %15 = arith.subf %11, %14 : vector<1x8x8xf32>
    %16 = math.exp %15 : vector<1x8x8xf32>
    %cst_6 = arith.constant dense<0.000000e+00> : vector<1x8xf32>
    %17 = vector.multi_reduction <add>, %16, %cst_6 [2] : vector<1x8x8xf32> to vector<1x8xf32>
    %18 = vector.shape_cast %17 : vector<1x8xf32> to vector<1x8x1xf32>
    "tpu.trace_start"() <{level = 10 : i32, message = "bnm,bmv->bnv"}> : () -> ()
    %cst_7 = arith.constant dense<0.000000e+00> : vector<1x8x128xf32>
    %19 = tpu.matmul %16, %10, %cst_7 {dimension_numbers = #tpu.dot_dimension_numbers<[2], [1], [1], [2], [0, 0, 0, 1, 1, 2], [0], [0]>} : vector<1x8x8xf32>, vector<1x8x128xf32>, vector<1x8x128xf32> -> vector<1x8x128xf32>
    "tpu.trace_stop"() : () -> ()
    %20 = tpu.reciprocal %18 {approx = true} : vector<1x8x1xf32> -> vector<1x8x1xf32>
    %21 = arith.mulf %18, %20 : vector<1x8x1xf32>
    %cst_8 = arith.constant 2.000000e+00 : f32
    %22 = vector.broadcast %cst_8 : f32 to vector<1x8x1xf32>
    %23 = arith.subf %22, %21 : vector<1x8x1xf32>
    %24 = arith.mulf %20, %23 : vector<1x8x1xf32>
    %25 = vector.broadcast %24 : vector<1x8x1xf32> to vector<1x8x128xf32>
    %26 = arith.mulf %19, %25 : vector<1x8x128xf32>
    %c0_9 = arith.constant 0 : index
    %c0_10 = arith.constant 0 : index
    %c0_11 = arith.constant 0 : index
    %27 = vector.load %arg3[%c0_9, %c0_10, %c0_11] : memref<1x8x128xf32, #tpu.memory_space<vmem>>, vector<1x8x128xf32>
    tpu.vector_store %arg3[%c0_9, %c0_10, %c0_11], %26 {strides = array<i32>} : memref<1x8x128xf32, #tpu.memory_space<vmem>>, vector<1x8x128xf32>,
    return
  }
  func.func @transform_0(%arg0: i32) -> (i32, i32) {
    %c0_i32 = arith.constant 0 : i32
    %c0_i32_0 = arith.constant 0 : i32
    return %arg0, %c0_i32 : i32, i32
  }
  func.func @transform_1(%arg0: i32) -> (i32, i32) {
    %c0_i32 = arith.constant 0 : i32
    %c0_i32_0 = arith.constant 0 : i32
    %c0_i32_1 = arith.constant 0 : i32
    return %c0_i32, %c0_i32_0 : i32, i32
  }
  func.func @transform_2(%arg0: i32) -> (i32, i32, i32) {
    %c0_i32 = arith.constant 0 : i32
    %c0_i32_0 = arith.constant 0 : i32
    %c0_i32_1 = arith.constant 0 : i32
    return %arg0, %c0_i32, %c0_i32_0 : i32, i32, i32
  }
}

</mosaic_0001>

<bundles_post_ra>
// kernel: tpu_custom_call.1
= control target key start
LH: loop header
LB: loop body
LE: loop exit
PB: predicated region body
PF: predicated region fallthrough
CT: control target
= control target key end

     0   :  { %7 = vsyncpa [#allocation3], 0  ;;  %s1071_s0 = inlined_call_operand.hbm [shape: f32[16,32], index: 0, kind: input, shape index: {}]   ;;  %s1072_s1 = inlined_call_operand.hbm [shape: f32[32,384], index: 1, kind: input, shape index: {}]   ;;  %s1073_s2 = inlined_call_operand.hbm [shape: f32[2,8,128], index: 2, kind: output, shape index: {}]  }
   0x1   :  { %9 = vsyncpa [#allocation3 + $0x1], 0 }
   0x2   :  { %10 = vsyncpa [#allocation6], 0 }
   0x3   :  { %11 = vsyncpa [#allocation4], 0 }
   0x4   :  { %13 = vsyncpa [#allocation4 + $0x1], 0  ;;  %s866_s9 = smov 0   ;;  %s868_s10 = smov 0  }
   0x5   :  { %s870_s11 = smov 0   ;;  %s872_s12 = smov 0  }
   0x6 LB: > { %s887_s13 = sadd.s32 4294967295, %s841_s12   ;;  %s586_s14 = sadd.s32 4294967294, %s841_s12   ;;  %s841_s12 = sphi %s872_s12, %s1093_s12   ;;  %s837_s11 = sphi %s870_s11, %s1092_s11   ;;  %s833_s10 = sphi %s868_s10, %s1091_s10   ;;  %s829_s9 = sphi %s866_s9, %s1090_s9  }
   0x7   : > { %p39_p0 = scmp.ne.s32.totalorder %s833_s10, %s829_s9  ;;  %p1074_p1 = scmp.eq.s32.totalorder %s887_s13, 0 }
   0x8   : > { %p90_p3 = scmp.eq.s32.totalorder %s586_s14, 1  ;;  %p587_p5 = scmp.ge.s32.totalorder %s841_s12, 1 }
   0x9   : > { %p896_p4 = por %p1074_p1, %p39_p0  ;;  %p97_p7 = scmp.lt.s32.totalorder %s841_s12, 3 }
   0xa   : > { %p901_p6 = por %p90_p3, %p39_p0  ;;  %s843_s18 = smov [#allocation5]  }
   0xb   : > { %s1077_s15 = scalar_select %p896_p4, 1, 0 }
   0xc   : > { %s1078_s16 = scalar_select %p901_p6, 1, 0 }
   0xd   : > { %p906_p8 = pnand %p587_p5, %p97_p7  ;;  %s109_s19 = sshll.u32 %s843_s18, 4  ;;  %s910_s19 = int_to_ptr.vmem [resolvable:$true] %s109_s19 }
   0xe   : > { %s922_s21 = sadd.s32 1, %s841_s12   ;;  %s26_s22 = sadd.s32 1, %s837_s11 }
   0xf   : > { %s1079_s17 = scalar_select %p906_p8, 1, 0 }
  0x10   : > { %p655_p9 = pneg %p906_p8  ;;  %s23_s23 = ssub.s32 %s841_s12, %s922_s21 }
  0x11   : > { %s713_s26 = scalar_lea.hbm %s1072_s1, 1536 }
  0x12   : > { %p917_p11 = pnand %p655_p9, %p1074_p1  ;;  %p714_p12 = scmp.ne.s32.totalorder %s1072_s1, %s713_s26 }
  0x13   : > { %p720_p5 = scmp.lt.u32.totalorder %s713_s26, %s1072_s1 }
  0x14   : > { %p715_p13 = pneg %p917_p11 }
  0x16   : > { %p716_p0 = pnand %p715_p13, %p714_p12 }
  0x18   : > { %p717_p3 = pneg %p716_p0 }
  0x1a   : > { %p722_p7 = pnand %p720_p5, %p717_p3 }
  0x1c   : > { %725 = shalt.err (!%p722_p7)
}
  0x1d   : > { %s726_s3 = scalar_lea.vmem %s910_s19, 1536  ;;  %p734_p2 = scmp.lt.s32.totalorder %s910_s19, %s910_s19 }
  0x1e   : > { %p727_p9 = scmp.ne.s32.totalorder %s910_s19, %s726_s3  ;;  %p735_p6 = scmp.lt.s32.totalorder %s726_s3, %s726_s3 }
  0x20   : > { %p729_p10 = pnand %p727_p9, %p715_p13  ;;  %p736_p4 = por %p735_p6, %p734_p2 }
  0x22   : > { %p730_p1 = pneg %p729_p10 }
  0x24   : > { %p737_p8 = pnand %p736_p4, %p730_p1 }
  0x26   : > { %740 = shalt.err (!%p737_p8)
}
  0x27   : > { %s844_s4 = smov 384   ;;  %s845_s5 = smov 24  }
  0x28   : > { %658 = dma.hbm_to_vmem [thread:$0]  (!%p917_p11), %s1072_s1, 1536, %s910_s19, [#allocation6], %s844_s4, %s844_s4, %s845_s5  }
  0x29   : > { %p24_p2 = scmp.eq.s32.totalorder %s23_s23, 0  ;;  %p33_p1 = scmp.ne.s32.totalorder %s837_s11, %s833_s10 }
  0x2a   : > { %p34_p4 = scmp.eq.s32.totalorder %s841_s12, 0  ;;  %p668_p6 = scmp.lt.s32.totalorder %s841_s12, 2 }
  0x2b   : > { %s953_s8 = scalar_select %p24_p2, %s837_s11, %s26_s22  }
  0x2c   : > { %p35_p8 = por %p34_p4, %p33_p1  ;;  %p1081_p10 = scmp.eq.s32.totalorder %s887_s13, 1 }
  0x2d   : > { %s123_s18 = sand.u32 1, %s837_s11   ;;  %s591_s24 = sshll.u32 %s841_s12, 7 }
  0x2e   : > { %p957_p12 = por %p1081_p10, %p33_p1  ;;  %s590_s25 = sshll.u32 %s123_s18, 3 }
  0x2f   : > { %s966_s27 = scalar_lea.hbm %s1071_s0, %s591_s24  ;;  %s127_s19 = scalar_lea.vmem [#allocation2], %s590_s25 }
  0x30   : > { %s134_s22 = sshll.u32 %s127_s19, 4  ;;  %p968_p11 = pnand %p668_p6, %p35_p8  ;;  %s972_s22 = int_to_ptr.vmem [resolvable:$true] %s134_s22 }
  0x31   : > { %s124_s28 = scalar_lea.sflag [#allocation3], %s123_s18  ;;  %s741_s29 = scalar_lea.hbm %s966_s27, 128 }
  0x32   : > { %p742_p13 = scmp.ne.s32.totalorder %s966_s27, %s741_s29  ;;  %p743_p0 = pneg %p968_p11 }
  0x33   : > { %s746_s4 = scalar_lea.hbm %s1071_s0, 256  ;;  %p747_p7 = scmp.lt.u32.totalorder %s966_s27, %s1071_s0 }
  0x34   : > { %p744_p3 = pnand %p743_p0, %p742_p13  ;;  %p748_p9 = scmp.lt.u32.totalorder %s746_s4, %s741_s29 }
  0x35   : > { %p750_p1 = scmp.lt.u32.totalorder %s741_s29, %s966_s27 }
  0x36   : > { %p745_p5 = pneg %p744_p3  ;;  %p749_p2 = por %p748_p9, %p747_p7 }
  0x38   : > { %p751_p4 = por %p750_p1, %p749_p2 }
  0x3a   : > { %p752_p6 = pnand %p751_p4, %p745_p5 }
  0x3c   : > { %755 = shalt.err (!%p752_p6)
}
  0x3d   : > { %s756_s7 = scalar_lea.vmem %s972_s22, 128  ;;  %s846_s18 = smov [#allocation2]  }
  0x3e   : > { %p757_p8 = scmp.ne.s32.totalorder %s972_s22, %s756_s7  ;;  %s761_s24 = sshll.u32 %s846_s18, 4  ;;  %s762_s24 = int_to_ptr.vmem [resolvable:$false] %s761_s24 }
  0x3f   : > { %s763_s25 = scalar_lea.vmem %s762_s24, 256  ;;  %p764_p3 = scmp.lt.s32.totalorder %s972_s22, %s762_s24 }
  0x40   : > { %p759_p10 = pnand %p757_p8, %p743_p0  ;;  %p765_p7 = scmp.lt.s32.totalorder %s763_s25, %s756_s7 }
  0x42   : > { %p760_p13 = pneg %p759_p10  ;;  %p766_p9 = por %p765_p7, %p764_p3 }
  0x44   : > { %p767_p2 = pnand %p766_p9, %p760_p13 }
  0x46   : > { %770 = shalt.err (!%p767_p2)
}
  0x47   : > { %662 = dma.hbm_to_vmem [thread:$0]  (!%p968_p11), %s966_s27, 128, %s972_s22, %s124_s28  }
  0x48   : > { %p1084_p5 = scmp.ne.s32.totalorder %s1079_s17, 0 }
  0x49   : > { %s1002_s20 = sand.u32 (!%p1084_p5), 1, %s833_s10   ;;  %p1085_p0 = scmp.ne.s32.totalorder (!%p1084_p5), %s1077_s15, 0 }
  0x4a   : > { %143 = sbr.rel (%p1084_p5) target bundleno = 910 (0x38e), region = 28  ;;  %s593_s26 = sshll.u32 (!%p1084_p5), %s1002_s20, 3 }
  0x4b   : > { %s146_s19 = scalar_lea.sflag (!%p1084_p5), [#allocation3], %s1002_s20  ;;  %s149_s29 = scalar_lea.vmem (!%p1084_p5), [#allocation2], %s593_s26 }
  0x51   : > { %816 = dma.done.wait (%p1085_p0), %s146_s19, 128  }
  0x52   : > { %818 = vsyncadd (%p1085_p0), %s146_s19, 4294967168  ;;  %p1086_p11 = scmp.eq.s32.totalorder %s887_s13, 0 }
  0x54   : > { %820 = dma.done.wait (%p1086_p11), [#allocation6], 1536   ;;  %p1087_p1 = pmov %p1086_p11 }
  0x55   : > { %v847_v0 = vmov 0.0   ;;  %v176_v1 = vld [vmem:[#allocation5 + $0x8] sm:$0xff]  ;;  %v179_v2 = vld [vmem:[#allocation5 + $0x20] sm:$0xff]  ;;  %v178_v5 = vld [vmem:[#allocation5 + $0x18] sm:$0xff]  ;;  %vm187_vm0 = vcmask 261120   ;;  %vm848_vm1 = vmmov 0  }
  0x56   : > { %822 = vsyncadd (%p1087_p1), [#allocation6], 4294965760  ;;  %255 = vmatprep.mubr.f32.mxu0 %v847_v0  ;;  %v175_v3 = vld [vmem:[#allocation5] sm:$0xff]  ;;  %v633_v4 = vpack.c.bf16 %v179_v2, %v176_v1  ;;  %v182_v6 = vld [vmem:[#allocation5 + $0x38] sm:$0xff]  ;;  %620 = vmatprep.mubr.msk.f32.mxu1 %vm848_vm1, %v847_v0  ;;  %v849_v17 = vmov 0.0|0.0   ;;  %vm403_vm2 = vcmask 64512  }
  0x57   : > { %v185_v7 = vld [vmem:[#allocation5 + $0x50] sm:$0xff]  ;;  %v635_v8 = vpack.c.bf16 %v178_v5, %v175_v3  ;;  %v184_v11 = vld [vmem:[#allocation5 + $0x48] sm:$0xff]  ;;  %v183_v16 = vld [vmem:[#allocation5 + $0x40] sm:$0xff]  ;;  %641 = vmatprep.subr.bf16.mxu1 %v849_v17  ;;  %s600_s15 = sshll.u32 %s887_s13, 7  ;;  %s173_s17 = scalar_lea.vmem [#allocation7], %s593_s26 }
  0x58   : > { %v637_v9 = vpack.c.bf16 %v185_v7, %v182_v6  ;;  %v181_v10 = vld [vmem:[#allocation5 + $0x30] sm:$0xff]  ;;  %634 = vmatprep.subr.bf16.mxu0 %v633_v4  ;;  %v180_v15 = vld [vmem:[#allocation5 + $0x28] sm:$0xff]  ;;  %v186_v19 = vld [vmem:[#allocation5 + $0x58] sm:$0xff]  ;;  %s506_s27 = sshll.u32 %s173_s17, 4  ;;  %s1027_s28 = scalar_lea.hbm %s1073_s2, %s600_s15  ;;  %s1029_s27 = int_to_ptr.vmem [resolvable:$true] %s506_s27 }
  0x59   : > { %636 = vmatpush1.bf16.msra.mxu0 %v635_v8  ;;  %v639_v12 = vpack.c.bf16 %v184_v11, %v181_v10  ;;  %v174_v13 = vld [vmem:[%s149_s29] sm:$0xff]  ;;  %v645_v20 = vpack.c.bf16 %v186_v19, %v183_v16  ;;  %s493_s30 = scalar_lea.sflag [#allocation4], %s1002_s20  ;;  %s771_s13 = scalar_lea.vmem %s1029_s27, 128 }
  0x5a   : > { %638 = vmatprep.subr.bf16.mxu0 %v637_v9  ;;  %v177_v14 = vld [vmem:[#allocation5 + $0x10] sm:$0xff]  ;;  %p772_p4 = scmp.ne.s32.totalorder %s1029_s27, %s771_s13  ;;  %s850_s3 = smov [#allocation7]  }
  0x5b   : > { %v642_v18 = vpack.c.bf16 %v180_v15, %v177_v14  ;;  %s775_s4 = sshll.u32 %s850_s3, 4  ;;  %s776_s4 = int_to_ptr.vmem [resolvable:$false] %s775_s4 }
  0x5c   : > { %p773_p6 = pnand %p772_p4, %p957_p12  ;;  %s777_s5 = scalar_lea.vmem %s776_s4, 256 }
  0x5d   : > { %640 = vmatpush1.bf16.msra.mxu0 %v639_v12  ;;  %643 = vmatpush3.bf16.msra.mxu1 %v642_v18  ;;  %p778_p10 = scmp.lt.s32.totalorder %s1029_s27, %s776_s4  ;;  %p779_p13 = scmp.lt.s32.totalorder %s777_s5, %s771_s13 }
  0x5e   : > { %623 = vmatprep.subr.mxu0 %v847_v0  ;;  %644 = vmatprep.subr.bf16.mxu1 %v849_v17  ;;  %p774_p8 = pneg %p773_p6 }
  0x5f   : > { %p780_p3 = por %p779_p13, %p778_p10 }
  0x60   : > { %596 = vmatmul.mubr.msk.f32.vlgmr.msra.gmra.mrb[0].mxu0 %vm187_vm0, %v174_v13 }
  0x61   : > { %625 = vmatprep.mubr.msk.f32.mxu0 %vm848_vm1, %v847_v0  ;;  %646 = vmatpush3.bf16.msra.mxu1 %v645_v20  ;;  %p781_p7 = pnand %p780_p3, %p774_p8 }
  0x62   : > { %628 = vmatprep.subr.mxu1 %v847_v0 }
  0x64   : > { %621 = vmatmul.mubr.msk.f32.vlgmr.msra.gmra.mrb[0].mxu1 %vm187_vm0, %v174_v13 }
  0x65   : > { %630 = vmatprep.mubr.msk.f32.mxu1 %vm848_vm1, %v847_v0 }
 0x133   : > { %v257_v21 = vpop.f32.mrb[0].mxu0 }
 0x134   : > { %v259_v22 = vpop.f32.mrb[1].mxu0  ;;  %v332_v23 = vmul.f32 0.25, %v257_v21 }
 0x135   : > { %624 = vmatpush3.xpose.msra.mxu0 %v259_v22 }
 0x137   : > { %v328_v27 = vpop.f32.mrb[0].mxu1 }
 0x138   : > { %626 = vmatmul.mubr.f32.vlgmr.msra.gmra.mrb[2].mxu0 %v332_v23  ;;  %v622_v28 = vpop.f32.mrb[1].mxu1  ;;  %629 = vmatpush3.msra.mxu1 %v328_v27 }
 0x20b   : > { %v399_v24 = vpop.f32.mrb[2].mxu0 }
 0x20c   : > { %v627_v25 = vpop.f32.mrb[3].mxu0  ;;  %v404_v26 = vsel %vm403_vm2, %v399_v24, -inf }
 0x20d   : > { %405 = vmax.xlane.f32.xlu0 %v404_v26 }
 0x29a   : > { %v406_v29 = vpop.xlane.xlu0 %405 }
 0x29b   : > { %v407_v30 = vsub.f32 %v399_v24, %v406_v29 }
 0x29d   : > { %v408_v31 = vmul.f32 1.442695, %v407_v30 }
 0x29f   : > { %709 = vpow2.f32 %v408_v31 }
 0x2a9   : > { %v710_v32 = vpop.eup %709 }
 0x2aa   : > { %631 = vmatmul.mubr.msk.f32.vlgmr.msra.gmra.mrb[2].mxu1 %vm403_vm2, %v710_v32  ;;  %v410_v33 = vsel %vm403_vm2, %v710_v32, 0.0 }
 0x2ab   : > { %411 = vadd.xlane.f32.xlu0 %v410_v33 }
 0x338   : > { %v412_v34 = vpop.xlane.xlu0 %411 }
 0x339   : > { %711 = vrcp.f32 %v412_v34 }
 0x343   : > { %v712_v35 = vpop.eup %711 }
 0x344   : > { %v487_v36 = vmul.f32 %v712_v35, %v412_v34 }
 0x346   : > { %v488_v37 = vsub.f32 2.0, %v487_v36 }
 0x348   : > { %v489_v38 = vmul.f32 %v712_v35, %v488_v37 }
 0x37d   : > { %v482_v39 = vpop.f32.mrb[2].mxu1 }
 0x37e   : > { %v490_v40 = vmul.f32 %v489_v38, %v482_v39  ;;  %v632_v41 = vpop.f32.mrb[3].mxu1 }
 0x380   : > { %491 = vst [vmem:[%s173_s17] sm:$0xff] %v490_v40 }
 0x381   : > { %784 = shalt.err (!%p781_p7)
}
 0x382   : > { %s785_s6 = scalar_lea.hbm %s1027_s28, 128  ;;  %s789_s24 = scalar_lea.hbm %s1073_s2, 256 }
 0x383   : > { %p786_p9 = scmp.ne.s32.totalorder %s1027_s28, %s785_s6  ;;  %p790_p0 = scmp.lt.u32.totalorder %s1027_s28, %s1073_s2 }
 0x384   : > { %p791_p11 = scmp.lt.u32.totalorder %s789_s24, %s785_s6  ;;  %p793_p4 = scmp.lt.u32.totalorder %s785_s6, %s1027_s28 }
 0x385   : > { %p787_p2 = pnand %p786_p9, %p957_p12 }
 0x386   : > { %p792_p1 = por %p791_p11, %p790_p0 }
 0x387   : > { %p788_p5 = pneg %p787_p2 }
 0x388   : > { %p794_p6 = por %p793_p4, %p792_p1 }
 0x38a   : > { %p795_p8 = pnand %p794_p6, %p788_p5 }
 0x38c   : > { %798 = shalt.err (!%p795_p8)
}
 0x38d   : > { %653 = dma.vmem_to_hbm [thread:$0]  (%p957_p12), %s1029_s27, 128, %s1027_s28, %s493_s30  }
 0x38e PF: > { %s518_s26 = sand.u32 1, %s829_s9   ;;  %p1088_p10 = scmp.ne.s32.totalorder %s1078_s16, 0 }
 0x38f   : > { %p1089_p13 = scmp.ge.s32.totalorder %s841_s12, 2  ;;  %s519_s19 = scalar_lea.sflag [#allocation4], %s518_s26 }
 0x391   : > { %p664_p3 = pnand %p1089_p13, %p1088_p10 }
 0x393   : > { %824 = dma.done.wait (!%p664_p3), %s519_s19, 128  }
 0x394   : > { %826 = vsyncadd (!%p664_p3), %s519_s19, 4294967168  ;;  %p16_p7 = scmp.ge.s32.totalorder %s922_s21, 4   ;;  %s1090_s9 = smov %s833_s10 }
 0x395   : > { %s1091_s10 = smov %s837_s11  ;;  %s1092_s11 = smov %s953_s8 }
 0x396   : > { %s1093_s12 = smov %s922_s21  ;;  %18 = sbr.rel (!%p16_p7) target bundleno = 6 (0x6), region = 77 }
 0x39d   :  { %524 = vsyncpa [#allocation3], 1 }
 0x39e   :  { %526 = vsyncpa [#allocation3 + $0x1], 1 }
 0x39f   :  { %527 = vsyncpa [#allocation6], 1 }
 0x3a0   :  { %528 = vsyncpa [#allocation4], 1 }
 0x3a1   :  { %530 = vsyncpa [#allocation4 + $0x1], 1 }

</bundles_post_ra>
